<compile_context>
chip_gen: v7x
topology: tpu7x:2x2x1
jax: 0.10.0
libtpu: 0.0.40
codegen_flags: <defaults>
</compile_context>

<pallas_src>
import jax
import jax.numpy as jnp
from jax import lax
from jax.experimental import pallas as pl
from jax.experimental.pallas import tpu as pltpu


_SIZES = ((6, 8), (4, 6), (2, 4), (1, 2))   # (fan_out, fan_in) per layer
_CHUNK_ROWS = 8                              # 8 sublanes x 128 lanes = 1024 batch elems
_MAX_TILE_ROWS = 1024                        # 1024*128 = 131072 batch elems / grid step


def _pack_params(params):
    """Fold sigmoid(z)=0.5*tanh(0.5 z)+0.5 into W/b and flatten to one vector.

    The kernel computes t_l = tanh(W'_l t_{l-1} + b'_l) with t_0 = x and
    returns 0.5*t_4 + 0.5, where
        W'_1 = 0.5  W_1,          b'_1 = 0.5 b_1
        W'_l = 0.25 W_l (l>=2),   b'_l = 0.5 b_l + 0.25 * (W_l @ 1)
    """
    flat = []
    for l, (fan_out, fan_in) in enumerate(_SIZES, start=1):
        w = params[f"w{l}"].astype(jnp.float32)
        b = params[f"b{l}"][:, 0].astype(jnp.float32)
        if l == 1:
            wp, bp = 0.5 * w, 0.5 * b
        else:
            wp, bp = 0.25 * w, 0.5 * b + 0.25 * jnp.sum(w, axis=1)
        flat.append(wp.reshape(-1))
        flat.append(bp.reshape(-1))
    return jnp.concatenate(flat)             # (95,) f32


def fnn_kernel(w_ref, x_ref, o_ref):
    """w_ref: (95,) f32 SMEM. x_ref: (8, R, 128) VMEM. o_ref: (1, R, 128) VMEM."""
    # Hoist the 95 scalar weight reads out of the row loop (SMEM -> sregs).
    layers = []
    off = 0
    for fan_out, fan_in in _SIZES:
        w = [[w_ref[off + o * fan_in + i] for i in range(fan_in)]
             for o in range(fan_out)]
        off += fan_out * fan_in
        b = [w_ref[off + o] for o in range(fan_out)]
        off += fan_out
        layers.append((w, b))

    n_chunks = x_ref.shape[1] // _CHUNK_ROWS

    def body(c, carry):
        r0 = pl.multiple_of(c * _CHUNK_ROWS, _CHUNK_ROWS)
        # 8 feature channels, each a dense (8,128) vreg tile of batch elements.
        h = [x_ref[i, pl.ds(r0, _CHUNK_ROWS), :] for i in range(_SIZES[0][1])]
        for w, b in layers:          # VPU broadcast-FMA chain; tanh on the EUP
            new_h = []
            for o in range(len(w)):
                z = h[0] * w[o][0]
                for i in range(1, len(h)):
                    z = z + h[i] * w[o][i]
                new_h.append(jnp.tanh(z + b[o]))
            h = new_h
        # Sigmoid affine kept only on the last layer (rest folded into params).
        o_ref[0, pl.ds(r0, _CHUNK_ROWS), :] = 0.5 * h[0] + 0.5
        return carry

    lax.fori_loop(0, n_chunks, body, 0, unroll=min(4, n_chunks))


def _pick_tile_rows(nb, *, max_rows=_MAX_TILE_ROWS, min_blocks=4):
    # Biggest tile (multiple of the 8-row chunk, capped for VMEM) that still
    # leaves >= min_blocks grid steps when the batch allows it (v7x megacore).
    target = pl.cdiv(nb, min_blocks)
    rows = ((target + _CHUNK_ROWS - 1) // _CHUNK_ROWS) * _CHUNK_ROWS
    return max(_CHUNK_ROWS, min(max_rows, rows, nb))


def fnn_forward(x, params):
    """x: (B, 8) float32 -> (B, 1) float32, matching FNNModel.forward."""
    B = x.shape[0]
    # TODO(synk): produce x feature-major (8, B) upstream (or fuse this MLP into
    # the producing op) to eliminate this extra HBM relayout pass.
    xt = jnp.transpose(x)                                  # (8, B)
    pad = (-B) % (_CHUNK_ROWS * 128)
    if pad:                                                # tail-only pad
        xt = jnp.pad(xt, ((0, 0), (0, pad)))
    Bp = B + pad
    nb = Bp // 128
    x3 = xt.reshape(8, nb, 128)                            # free row-major reshape

    w_flat = _pack_params(params)                          # -> SMEM
    tile_rows = _pick_tile_rows(nb)
    n_blocks = pl.cdiv(nb, tile_rows)

    out3 = pl.pallas_call(
        fnn_kernel,
        out_shape=jax.ShapeDtypeStruct((1, nb, 128), jnp.float32),
        grid=(n_blocks,),
        in_specs=[
            pl.BlockSpec(memory_space=pltpu.MemorySpace.SMEM),       # packed W/b
            pl.BlockSpec((8, tile_rows, 128), lambda i: (0, i, 0)),  # x tile
        ],
        out_specs=pl.BlockSpec((1, tile_rows, 128), lambda i: (0, i, 0)),
        compiler_params=pltpu.CompilerParams(
            dimension_semantics=("parallel",)),
    )(w_flat, x3)

    return out3.reshape(-1)[:B].reshape(B, 1)


def init_params(key):
    """Deterministic init matching nn.Linear shapes (W: (out,in), b: (out,1))."""
    params = {}
    for i, (fan_out, fan_in) in enumerate(_SIZES, start=1):
        kw, kb, key = jax.random.split(key, 3)
        bound = float(fan_in) ** -0.5
        params[f"w{i}"] = jax.random.uniform(
            kw, (fan_out, fan_in), jnp.float32, -bound, bound)
        params[f"b{i}"] = jax.random.uniform(
            kb, (fan_out, 1), jnp.float32, -bound, bound)
    return params


def fnn_reference(x, params):
    h = x
    for i in range(1, 5):
        h = jax.nn.sigmoid(h @ params[f"w{i}"].T + params[f"b{i}"][:, 0])
    return h


if __name__ == "__main__":
    key = jax.random.PRNGKey(0)
    kx, kp = jax.random.split(key)
    params = init_params(kp)

    # Small test: single grid block.
    B = 256
    x = jax.random.normal(kx, (B, 8), jnp.float32)
    out = jax.block_until_ready(fnn_forward(x, params))
    ref = fnn_reference(x, params)
    assert out.shape == (B, 1)
    assert jnp.allclose(out, ref, atol=1e-4, rtol=1e-4), (
        float(jnp.max(jnp.abs(out - ref))))

    # Larger test: multi-block grid + ragged last block.
    B2 = 5000
    x2 = jax.random.normal(jax.random.PRNGKey(1), (B2, 8), jnp.float32)
    out2 = jax.block_until_ready(fnn_forward(x2, params))
    ref2 = fnn_reference(x2, params)
    assert out2.shape == (B2, 1)
    assert jnp.allclose(out2, ref2, atol=1e-4, rtol=1e-4), (
        float(jnp.max(jnp.abs(out2 - ref2))))

    print("KERNEL_OK")
</pallas_src>

<mosaic_0001>
module attributes {stable_mosaic.version = 11 : i64} {
  func.func @fnn_kernel(%arg0: i32, %arg1: memref<95xf32, #tpu.memory_space<smem>>, %arg2: memref<8x8x128xf32, #tpu.memory_space<vmem>>, %arg3: memref<1x8x128xf32, #tpu.memory_space<vmem>>) attributes {dimension_semantics = [#tpu.dimension_semantics<parallel>], iteration_bounds = array<i64: 1>, scalar_prefetch = 0 : i64, scratch_operands = 0 : i64, tpu.core_type = #tpu.core_type<tc>, window_params = [{transform_indices = @transform_0, window_bounds = array<i64: 95>}, {transform_indices = @transform_1, window_bounds = array<i64: 8, 8, 128>}, {transform_indices = @transform_2, window_bounds = array<i64: 1, 8, 128>}]} {
    %c0 = arith.constant 0 : index
    %0 = memref.load %arg1[%c0] : memref<95xf32, #tpu.memory_space<smem>>
    %c1 = arith.constant 1 : index
    %1 = memref.load %arg1[%c1] : memref<95xf32, #tpu.memory_space<smem>>
    %c2 = arith.constant 2 : index
    %2 = memref.load %arg1[%c2] : memref<95xf32, #tpu.memory_space<smem>>
    %c3 = arith.constant 3 : index
    %3 = memref.load %arg1[%c3] : memref<95xf32, #tpu.memory_space<smem>>
    %c4 = arith.constant 4 : index
    %4 = memref.load %arg1[%c4] : memref<95xf32, #tpu.memory_space<smem>>
    %c5 = arith.constant 5 : index
    %5 = memref.load %arg1[%c5] : memref<95xf32, #tpu.memory_space<smem>>
    %c6 = arith.constant 6 : index
    %6 = memref.load %arg1[%c6] : memref<95xf32, #tpu.memory_space<smem>>
    %c7 = arith.constant 7 : index
    %7 = memref.load %arg1[%c7] : memref<95xf32, #tpu.memory_space<smem>>
    %c8 = arith.constant 8 : index
    %8 = memref.load %arg1[%c8] : memref<95xf32, #tpu.memory_space<smem>>
    %c9 = arith.constant 9 : index
    %9 = memref.load %arg1[%c9] : memref<95xf32, #tpu.memory_space<smem>>
    %c10 = arith.constant 10 : index
    %10 = memref.load %arg1[%c10] : memref<95xf32, #tpu.memory_space<smem>>
    %c11 = arith.constant 11 : index
    %11 = memref.load %arg1[%c11] : memref<95xf32, #tpu.memory_space<smem>>
    %c12 = arith.constant 12 : index
    %12 = memref.load %arg1[%c12] : memref<95xf32, #tpu.memory_space<smem>>
    %c13 = arith.constant 13 : index
    %13 = memref.load %arg1[%c13] : memref<95xf32, #tpu.memory_space<smem>>
    %c14 = arith.constant 14 : index
    %14 = memref.load %arg1[%c14] : memref<95xf32, #tpu.memory_space<smem>>
    %c15 = arith.constant 15 : index
    %15 = memref.load %arg1[%c15] : memref<95xf32, #tpu.memory_space<smem>>
    %c16 = arith.constant 16 : index
    %16 = memref.load %arg1[%c16] : memref<95xf32, #tpu.memory_space<smem>>
    %c17 = arith.constant 17 : index
    %17 = memref.load %arg1[%c17] : memref<95xf32, #tpu.memory_space<smem>>
    %c18 = arith.constant 18 : index
    %18 = memref.load %arg1[%c18] : memref<95xf32, #tpu.memory_space<smem>>
    %c19 = arith.constant 19 : index
    %19 = memref.load %arg1[%c19] : memref<95xf32, #tpu.memory_space<smem>>
    %c20 = arith.constant 20 : index
    %20 = memref.load %arg1[%c20] : memref<95xf32, #tpu.memory_space<smem>>
    %c21 = arith.constant 21 : index
    %21 = memref.load %arg1[%c21] : memref<95xf32, #tpu.memory_space<smem>>
    %c22 = arith.constant 22 : index
    %22 = memref.load %arg1[%c22] : memref<95xf32, #tpu.memory_space<smem>>
    %c23 = arith.constant 23 : index
    %23 = memref.load %arg1[%c23] : memref<95xf32, #tpu.memory_space<smem>>
    %c24 = arith.constant 24 : index
    %24 = memref.load %arg1[%c24] : memref<95xf32, #tpu.memory_space<smem>>
    %c25 = arith.constant 25 : index
    %25 = memref.load %arg1[%c25] : memref<95xf32, #tpu.memory_space<smem>>
    %c26 = arith.constant 26 : index
    %26 = memref.load %arg1[%c26] : memref<95xf32, #tpu.memory_space<smem>>
    %c27 = arith.constant 27 : index
    %27 = memref.load %arg1[%c27] : memref<95xf32, #tpu.memory_space<smem>>
    %c28 = arith.constant 28 : index
    %28 = memref.load %arg1[%c28] : memref<95xf32, #tpu.memory_space<smem>>
    %c29 = arith.constant 29 : index
    %29 = memref.load %arg1[%c29] : memref<95xf32, #tpu.memory_space<smem>>
    %c30 = arith.constant 30 : index
    %30 = memref.load %arg1[%c30] : memref<95xf32, #tpu.memory_space<smem>>
    %c31 = arith.constant 31 : index
    %31 = memref.load %arg1[%c31] : memref<95xf32, #tpu.memory_space<smem>>
    %c32 = arith.constant 32 : index
    %32 = memref.load %arg1[%c32] : memref<95xf32, #tpu.memory_space<smem>>
    %c33 = arith.constant 33 : index
    %33 = memref.load %arg1[%c33] : memref<95xf32, #tpu.memory_space<smem>>
    %c34 = arith.constant 34 : index
    %34 = memref.load %arg1[%c34] : memref<95xf32, #tpu.memory_space<smem>>
    %c35 = arith.constant 35 : index
    %35 = memref.load %arg1[%c35] : memref<95xf32, #tpu.memory_space<smem>>
    %c36 = arith.constant 36 : index
    %36 = memref.load %arg1[%c36] : memref<95xf32, #tpu.memory_space<smem>>
    %c37 = arith.constant 37 : index
    %37 = memref.load %arg1[%c37] : memref<95xf32, #tpu.memory_space<smem>>
    %c38 = arith.constant 38 : index
    %38 = memref.load %arg1[%c38] : memref<95xf32, #tpu.memory_space<smem>>
    %c39 = arith.constant 39 : index
    %39 = memref.load %arg1[%c39] : memref<95xf32, #tpu.memory_space<smem>>
    %c40 = arith.constant 40 : index
    %40 = memref.load %arg1[%c40] : memref<95xf32, #tpu.memory_space<smem>>
    %c41 = arith.constant 41 : index
    %41 = memref.load %arg1[%c41] : memref<95xf32, #tpu.memory_space<smem>>
    %c42 = arith.constant 42 : index
    %42 = memref.load %arg1[%c42] : memref<95xf32, #tpu.memory_space<smem>>
    %c43 = arith.constant 43 : index
    %43 = memref.load %arg1[%c43] : memref<95xf32, #tpu.memory_space<smem>>
    %c44 = arith.constant 44 : index
    %44 = memref.load %arg1[%c44] : memref<95xf32, #tpu.memory_space<smem>>
    %c45 = arith.constant 45 : index
    %45 = memref.load %arg1[%c45] : memref<95xf32, #tpu.memory_space<smem>>
    %c46 = arith.constant 46 : index
    %46 = memref.load %arg1[%c46] : memref<95xf32, #tpu.memory_space<smem>>
    %c47 = arith.constant 47 : index
    %47 = memref.load %arg1[%c47] : memref<95xf32, #tpu.memory_space<smem>>
    %c48 = arith.constant 48 : index
    %48 = memref.load %arg1[%c48] : memref<95xf32, #tpu.memory_space<smem>>
    %c49 = arith.constant 49 : index
    %49 = memref.load %arg1[%c49] : memref<95xf32, #tpu.memory_space<smem>>
    %c50 = arith.constant 50 : index
    %50 = memref.load %arg1[%c50] : memref<95xf32, #tpu.memory_space<smem>>
    %c51 = arith.constant 51 : index
    %51 = memref.load %arg1[%c51] : memref<95xf32, #tpu.memory_space<smem>>
    %c52 = arith.constant 52 : index
    %52 = memref.load %arg1[%c52] : memref<95xf32, #tpu.memory_space<smem>>
    %c53 = arith.constant 53 : index
    %53 = memref.load %arg1[%c53] : memref<95xf32, #tpu.memory_space<smem>>
    %c54 = arith.constant 54 : index
    %54 = memref.load %arg1[%c54] : memref<95xf32, #tpu.memory_space<smem>>
    %c55 = arith.constant 55 : index
    %55 = memref.load %arg1[%c55] : memref<95xf32, #tpu.memory_space<smem>>
    %c56 = arith.constant 56 : index
    %56 = memref.load %arg1[%c56] : memref<95xf32, #tpu.memory_space<smem>>
    %c57 = arith.constant 57 : index
    %57 = memref.load %arg1[%c57] : memref<95xf32, #tpu.memory_space<smem>>
    %c58 = arith.constant 58 : index
    %58 = memref.load %arg1[%c58] : memref<95xf32, #tpu.memory_space<smem>>
    %c59 = arith.constant 59 : index
    %59 = memref.load %arg1[%c59] : memref<95xf32, #tpu.memory_space<smem>>
    %c60 = arith.constant 60 : index
    %60 = memref.load %arg1[%c60] : memref<95xf32, #tpu.memory_space<smem>>
    %c61 = arith.constant 61 : index
    %61 = memref.load %arg1[%c61] : memref<95xf32, #tpu.memory_space<smem>>
    %c62 = arith.constant 62 : index
    %62 = memref.load %arg1[%c62] : memref<95xf32, #tpu.memory_space<smem>>
    %c63 = arith.constant 63 : index
    %63 = memref.load %arg1[%c63] : memref<95xf32, #tpu.memory_space<smem>>
    %c64 = arith.constant 64 : index
    %64 = memref.load %arg1[%c64] : memref<95xf32, #tpu.memory_space<smem>>
    %c65 = arith.constant 65 : index
    %65 = memref.load %arg1[%c65] : memref<95xf32, #tpu.memory_space<smem>>
    %c66 = arith.constant 66 : index
    %66 = memref.load %arg1[%c66] : memref<95xf32, #tpu.memory_space<smem>>
    %c67 = arith.constant 67 : index
    %67 = memref.load %arg1[%c67] : memref<95xf32, #tpu.memory_space<smem>>
    %c68 = arith.constant 68 : index
    %68 = memref.load %arg1[%c68] : memref<95xf32, #tpu.memory_space<smem>>
    %c69 = arith.constant 69 : index
    %69 = memref.load %arg1[%c69] : memref<95xf32, #tpu.memory_space<smem>>
    %c70 = arith.constant 70 : index
    %70 = memref.load %arg1[%c70] : memref<95xf32, #tpu.memory_space<smem>>
    %c71 = arith.constant 71 : index
    %71 = memref.load %arg1[%c71] : memref<95xf32, #tpu.memory_space<smem>>
    %c72 = arith.constant 72 : index
    %72 = memref.load %arg1[%c72] : memref<95xf32, #tpu.memory_space<smem>>
    %c73 = arith.constant 73 : index
    %73 = memref.load %arg1[%c73] : memref<95xf32, #tpu.memory_space<smem>>
    %c74 = arith.constant 74 : index
    %74 = memref.load %arg1[%c74] : memref<95xf32, #tpu.memory_space<smem>>
    %c75 = arith.constant 75 : index
    %75 = memref.load %arg1[%c75] : memref<95xf32, #tpu.memory_space<smem>>
    %c76 = arith.constant 76 : index
    %76 = memref.load %arg1[%c76] : memref<95xf32, #tpu.memory_space<smem>>
    %c77 = arith.constant 77 : index
    %77 = memref.load %arg1[%c77] : memref<95xf32, #tpu.memory_space<smem>>
    %c78 = arith.constant 78 : index
    %78 = memref.load %arg1[%c78] : memref<95xf32, #tpu.memory_space<smem>>
    %c79 = arith.constant 79 : index
    %79 = memref.load %arg1[%c79] : memref<95xf32, #tpu.memory_space<smem>>
    %c80 = arith.constant 80 : index
    %80 = memref.load %arg1[%c80] : memref<95xf32, #tpu.memory_space<smem>>
    %c81 = arith.constant 81 : index
    %81 = memref.load %arg1[%c81] : memref<95xf32, #tpu.memory_space<smem>>
    %c82 = arith.constant 82 : index
    %82 = memref.load %arg1[%c82] : memref<95xf32, #tpu.memory_space<smem>>
    %c83 = arith.constant 83 : index
    %83 = memref.load %arg1[%c83] : memref<95xf32, #tpu.memory_space<smem>>
    %c84 = arith.constant 84 : index
    %84 = memref.load %arg1[%c84] : memref<95xf32, #tpu.memory_space<smem>>
    %c85 = arith.constant 85 : index
    %85 = memref.load %arg1[%c85] : memref<95xf32, #tpu.memory_space<smem>>
    %c86 = arith.constant 86 : index
    %86 = memref.load %arg1[%c86] : memref<95xf32, #tpu.memory_space<smem>>
    %c87 = arith.constant 87 : index
    %87 = memref.load %arg1[%c87] : memref<95xf32, #tpu.memory_space<smem>>
    %c88 = arith.constant 88 : index
    %88 = memref.load %arg1[%c88] : memref<95xf32, #tpu.memory_space<smem>>
    %c89 = arith.constant 89 : index
    %89 = memref.load %arg1[%c89] : memref<95xf32, #tpu.memory_space<smem>>
    %c90 = arith.constant 90 : index
    %90 = memref.load %arg1[%c90] : memref<95xf32, #tpu.memory_space<smem>>
    %c91 = arith.constant 91 : index
    %91 = memref.load %arg1[%c91] : memref<95xf32, #tpu.memory_space<smem>>
    %c92 = arith.constant 92 : index
    %92 = memref.load %arg1[%c92] : memref<95xf32, #tpu.memory_space<smem>>
    %c93 = arith.constant 93 : index
    %93 = memref.load %arg1[%c93] : memref<95xf32, #tpu.memory_space<smem>>
    %c94 = arith.constant 94 : index
    %94 = memref.load %arg1[%c94] : memref<95xf32, #tpu.memory_space<smem>>
    %c0_i32 = arith.constant 0 : i32
    %c8_i32 = arith.constant 8 : i32
    %95 = arith.muli %c0_i32, %c8_i32 : i32
    %96 = tpu.assume_multiple %95, 8 : i32
    %c0_0 = arith.constant 0 : index
    %97 = arith.index_cast %96 : i32 to index
    %c0_1 = arith.constant 0 : index
    %98 = vector.load %arg2[%c0_0, %97, %c0_1] : memref<8x8x128xf32, #tpu.memory_space<vmem>>, vector<1x8x128xf32>
    %99 = vector.shape_cast %98 : vector<1x8x128xf32> to vector<8x128xf32>
    %c1_2 = arith.constant 1 : index
    %100 = arith.index_cast %96 : i32 to index
    %c0_3 = arith.constant 0 : index
    %101 = vector.load %arg2[%c1_2, %100, %c0_3] : memref<8x8x128xf32, #tpu.memory_space<vmem>>, vector<1x8x128xf32>
    %102 = vector.shape_cast %101 : vector<1x8x128xf32> to vector<8x128xf32>
    %c2_4 = arith.constant 2 : index
    %103 = arith.index_cast %96 : i32 to index
    %c0_5 = arith.constant 0 : index
    %104 = vector.load %arg2[%c2_4, %103, %c0_5] : memref<8x8x128xf32, #tpu.memory_space<vmem>>, vector<1x8x128xf32>
    %105 = vector.shape_cast %104 : vector<1x8x128xf32> to vector<8x128xf32>
    %c3_6 = arith.constant 3 : index
    %106 = arith.index_cast %96 : i32 to index
    %c0_7 = arith.constant 0 : index
    %107 = vector.load %arg2[%c3_6, %106, %c0_7] : memref<8x8x128xf32, #tpu.memory_space<vmem>>, vector<1x8x128xf32>
    %108 = vector.shape_cast %107 : vector<1x8x128xf32> to vector<8x128xf32>
    %c4_8 = arith.constant 4 : index
    %109 = arith.index_cast %96 : i32 to index
    %c0_9 = arith.constant 0 : index
    %110 = vector.load %arg2[%c4_8, %109, %c0_9] : memref<8x8x128xf32, #tpu.memory_space<vmem>>, vector<1x8x128xf32>
    %111 = vector.shape_cast %110 : vector<1x8x128xf32> to vector<8x128xf32>
    %c5_10 = arith.constant 5 : index
    %112 = arith.index_cast %96 : i32 to index
    %c0_11 = arith.constant 0 : index
    %113 = vector.load %arg2[%c5_10, %112, %c0_11] : memref<8x8x128xf32, #tpu.memory_space<vmem>>, vector<1x8x128xf32>
    %114 = vector.shape_cast %113 : vector<1x8x128xf32> to vector<8x128xf32>
    %c6_12 = arith.constant 6 : index
    %115 = arith.index_cast %96 : i32 to index
    %c0_13 = arith.constant 0 : index
    %116 = vector.load %arg2[%c6_12, %115, %c0_13] : memref<8x8x128xf32, #tpu.memory_space<vmem>>, vector<1x8x128xf32>
    %117 = vector.shape_cast %116 : vector<1x8x128xf32> to vector<8x128xf32>
    %c7_14 = arith.constant 7 : index
    %118 = arith.index_cast %96 : i32 to index
    %c0_15 = arith.constant 0 : index
    %119 = vector.load %arg2[%c7_14, %118, %c0_15] : memref<8x8x128xf32, #tpu.memory_space<vmem>>, vector<1x8x128xf32>
    %120 = vector.shape_cast %119 : vector<1x8x128xf32> to vector<8x128xf32>
    %121 = vector.broadcast %0 : f32 to vector<8x128xf32>
    %122 = arith.mulf %99, %121 : vector<8x128xf32>
    %123 = vector.broadcast %1 : f32 to vector<8x128xf32>
    %124 = arith.mulf %102, %123 : vector<8x128xf32>
    %125 = arith.addf %122, %124 : vector<8x128xf32>
    %126 = vector.broadcast %2 : f32 to vector<8x128xf32>
    %127 = arith.mulf %105, %126 : vector<8x128xf32>
    %128 = arith.addf %125, %127 : vector<8x128xf32>
    %129 = vector.broadcast %3 : f32 to vector<8x128xf32>
    %130 = arith.mulf %108, %129 : vector<8x128xf32>
    %131 = arith.addf %128, %130 : vector<8x128xf32>
    %132 = vector.broadcast %4 : f32 to vector<8x128xf32>
    %133 = arith.mulf %111, %132 : vector<8x128xf32>
    %134 = arith.addf %131, %133 : vector<8x128xf32>
    %135 = vector.broadcast %5 : f32 to vector<8x128xf32>
    %136 = arith.mulf %114, %135 : vector<8x128xf32>
    %137 = arith.addf %134, %136 : vector<8x128xf32>
    %138 = vector.broadcast %6 : f32 to vector<8x128xf32>
    %139 = arith.mulf %117, %138 : vector<8x128xf32>
    %140 = arith.addf %137, %139 : vector<8x128xf32>
    %141 = vector.broadcast %7 : f32 to vector<8x128xf32>
    %142 = arith.mulf %120, %141 : vector<8x128xf32>
    %143 = arith.addf %140, %142 : vector<8x128xf32>
    %144 = vector.broadcast %48 : f32 to vector<8x128xf32>
    %145 = arith.addf %143, %144 : vector<8x128xf32>
    %146 = math.tanh %145 : vector<8x128xf32>
    %147 = vector.broadcast %8 : f32 to vector<8x128xf32>
    %148 = arith.mulf %99, %147 : vector<8x128xf32>
    %149 = vector.broadcast %9 : f32 to vector<8x128xf32>
    %150 = arith.mulf %102, %149 : vector<8x128xf32>
    %151 = arith.addf %148, %150 : vector<8x128xf32>
    %152 = vector.broadcast %10 : f32 to vector<8x128xf32>
    %153 = arith.mulf %105, %152 : vector<8x128xf32>
    %154 = arith.addf %151, %153 : vector<8x128xf32>
    %155 = vector.broadcast %11 : f32 to vector<8x128xf32>
    %156 = arith.mulf %108, %155 : vector<8x128xf32>
    %157 = arith.addf %154, %156 : vector<8x128xf32>
    %158 = vector.broadcast %12 : f32 to vector<8x128xf32>
    %159 = arith.mulf %111, %158 : vector<8x128xf32>
    %160 = arith.addf %157, %159 : vector<8x128xf32>
    %161 = vector.broadcast %13 : f32 to vector<8x128xf32>
    %162 = arith.mulf %114, %161 : vector<8x128xf32>
    %163 = arith.addf %160, %162 : vector<8x128xf32>
    %164 = vector.broadcast %14 : f32 to vector<8x128xf32>
    %165 = arith.mulf %117, %164 : vector<8x128xf32>
    %166 = arith.addf %163, %165 : vector<8x128xf32>
    %167 = vector.broadcast %15 : f32 to vector<8x128xf32>
    %168 = arith.mulf %120, %167 : vector<8x128xf32>
    %169 = arith.addf %166, %168 : vector<8x128xf32>
    %170 = vector.broadcast %49 : f32 to vector<8x128xf32>
    %171 = arith.addf %169, %170 : vector<8x128xf32>
    %172 = math.tanh %171 : vector<8x128xf32>
    %173 = vector.broadcast %16 : f32 to vector<8x128xf32>
    %174 = arith.mulf %99, %173 : vector<8x128xf32>
    %175 = vector.broadcast %17 : f32 to vector<8x128xf32>
    %176 = arith.mulf %102, %175 : vector<8x128xf32>
    %177 = arith.addf %174, %176 : vector<8x128xf32>
    %178 = vector.broadcast %18 : f32 to vector<8x128xf32>
    %179 = arith.mulf %105, %178 : vector<8x128xf32>
    %180 = arith.addf %177, %179 : vector<8x128xf32>
    %181 = vector.broadcast %19 : f32 to vector<8x128xf32>
    %182 = arith.mulf %108, %181 : vector<8x128xf32>
    %183 = arith.addf %180, %182 : vector<8x128xf32>
    %184 = vector.broadcast %20 : f32 to vector<8x128xf32>
    %185 = arith.mulf %111, %184 : vector<8x128xf32>
    %186 = arith.addf %183, %185 : vector<8x128xf32>
    %187 = vector.broadcast %21 : f32 to vector<8x128xf32>
    %188 = arith.mulf %114, %187 : vector<8x128xf32>
    %189 = arith.addf %186, %188 : vector<8x128xf32>
    %190 = vector.broadcast %22 : f32 to vector<8x128xf32>
    %191 = arith.mulf %117, %190 : vector<8x128xf32>
    %192 = arith.addf %189, %191 : vector<8x128xf32>
    %193 = vector.broadcast %23 : f32 to vector<8x128xf32>
    %194 = arith.mulf %120, %193 : vector<8x128xf32>
    %195 = arith.addf %192, %194 : vector<8x128xf32>
    %196 = vector.broadcast %50 : f32 to vector<8x128xf32>
    %197 = arith.addf %195, %196 : vector<8x128xf32>
    %198 = math.tanh %197 : vector<8x128xf32>
    %199 = vector.broadcast %24 : f32 to vector<8x128xf32>
    %200 = arith.mulf %99, %199 : vector<8x128xf32>
    %201 = vector.broadcast %25 : f32 to vector<8x128xf32>
    %202 = arith.mulf %102, %201 : vector<8x128xf32>
    %203 = arith.addf %200, %202 : vector<8x128xf32>
    %204 = vector.broadcast %26 : f32 to vector<8x128xf32>
    %205 = arith.mulf %105, %204 : vector<8x128xf32>
    %206 = arith.addf %203, %205 : vector<8x128xf32>
    %207 = vector.broadcast %27 : f32 to vector<8x128xf32>
    %208 = arith.mulf %108, %207 : vector<8x128xf32>
    %209 = arith.addf %206, %208 : vector<8x128xf32>
    %210 = vector.broadcast %28 : f32 to vector<8x128xf32>
    %211 = arith.mulf %111, %210 : vector<8x128xf32>
    %212 = arith.addf %209, %211 : vector<8x128xf32>
    %213 = vector.broadcast %29 : f32 to vector<8x128xf32>
    %214 = arith.mulf %114, %213 : vector<8x128xf32>
    %215 = arith.addf %212, %214 : vector<8x128xf32>
    %216 = vector.broadcast %30 : f32 to vector<8x128xf32>
    %217 = arith.mulf %117, %216 : vector<8x128xf32>
    %218 = arith.addf %215, %217 : vector<8x128xf32>
    %219 = vector.broadcast %31 : f32 to vector<8x128xf32>
    %220 = arith.mulf %120, %219 : vector<8x128xf32>
    %221 = arith.addf %218, %220 : vector<8x128xf32>
    %222 = vector.broadcast %51 : f32 to vector<8x128xf32>
    %223 = arith.addf %221, %222 : vector<8x128xf32>
    %224 = math.tanh %223 : vector<8x128xf32>
    %225 = vector.broadcast %32 : f32 to vector<8x128xf32>
    %226 = arith.mulf %99, %225 : vector<8x128xf32>
    %227 = vector.broadcast %33 : f32 to vector<8x128xf32>
    %228 = arith.mulf %102, %227 : vector<8x128xf32>
    %229 = arith.addf %226, %228 : vector<8x128xf32>
    %230 = vector.broadcast %34 : f32 to vector<8x128xf32>
    %231 = arith.mulf %105, %230 : vector<8x128xf32>
    %232 = arith.addf %229, %231 : vector<8x128xf32>
    %233 = vector.broadcast %35 : f32 to vector<8x128xf32>
    %234 = arith.mulf %108, %233 : vector<8x128xf32>
    %235 = arith.addf %232, %234 : vector<8x128xf32>
    %236 = vector.broadcast %36 : f32 to vector<8x128xf32>
    %237 = arith.mulf %111, %236 : vector<8x128xf32>
    %238 = arith.addf %235, %237 : vector<8x128xf32>
    %239 = vector.broadcast %37 : f32 to vector<8x128xf32>
    %240 = arith.mulf %114, %239 : vector<8x128xf32>
    %241 = arith.addf %238, %240 : vector<8x128xf32>
    %242 = vector.broadcast %38 : f32 to vector<8x128xf32>
    %243 = arith.mulf %117, %242 : vector<8x128xf32>
    %244 = arith.addf %241, %243 : vector<8x128xf32>
    %245 = vector.broadcast %39 : f32 to vector<8x128xf32>
    %246 = arith.mulf %120, %245 : vector<8x128xf32>
    %247 = arith.addf %244, %246 : vector<8x128xf32>
    %248 = vector.broadcast %52 : f32 to vector<8x128xf32>
    %249 = arith.addf %247, %248 : vector<8x128xf32>
    %250 = math.tanh %249 : vector<8x128xf32>
    %251 = vector.broadcast %40 : f32 to vector<8x128xf32>
    %252 = arith.mulf %99, %251 : vector<8x128xf32>
    %253 = vector.broadcast %41 : f32 to vector<8x128xf32>
    %254 = arith.mulf %102, %253 : vector<8x128xf32>
    %255 = arith.addf %252, %254 : vector<8x128xf32>
    %256 = vector.broadcast %42 : f32 to vector<8x128xf32>
    %257 = arith.mulf %105, %256 : vector<8x128xf32>
    %258 = arith.addf %255, %257 : vector<8x128xf32>
    %259 = vector.broadcast %43 : f32 to vector<8x128xf32>
    %260 = arith.mulf %108, %259 : vector<8x128xf32>
    %261 = arith.addf %258, %260 : vector<8x128xf32>
    %262 = vector.broadcast %44 : f32 to vector<8x128xf32>
    %263 = arith.mulf %111, %262 : vector<8x128xf32>
    %264 = arith.addf %261, %263 : vector<8x128xf32>
    %265 = vector.broadcast %45 : f32 to vector<8x128xf32>
    %266 = arith.mulf %114, %265 : vector<8x128xf32>
    %267 = arith.addf %264, %266 : vector<8x128xf32>
    %268 = vector.broadcast %46 : f32 to vector<8x128xf32>
    %269 = arith.mulf %117, %268 : vector<8x128xf32>
    %270 = arith.addf %267, %269 : vector<8x128xf32>
    %271 = vector.broadcast %47 : f32 to vector<8x128xf32>
    %272 = arith.mulf %120, %271 : vector<8x128xf32>
    %273 = arith.addf %270, %272 : vector<8x128xf32>
    %274 = vector.broadcast %53 : f32 to vector<8x128xf32>
    %275 = arith.addf %273, %274 : vector<8x128xf32>
    %276 = math.tanh %275 : vector<8x128xf32>
    %277 = vector.broadcast %54 : f32 to vector<8x128xf32>
    %278 = arith.mulf %146, %277 : vector<8x128xf32>
    %279 = vector.broadcast %55 : f32 to vector<8x128xf32>
    %280 = arith.mulf %172, %279 : vector<8x128xf32>
    %281 = arith.addf %278, %280 : vector<8x128xf32>
    %282 = vector.broadcast %56 : f32 to vector<8x128xf32>
    %283 = arith.mulf %198, %282 : vector<8x128xf32>
    %284 = arith.addf %281, %283 : vector<8x128xf32>
    %285 = vector.broadcast %57 : f32 to vector<8x128xf32>
    %286 = arith.mulf %224, %285 : vector<8x128xf32>
    %287 = arith.addf %284, %286 : vector<8x128xf32>
    %288 = vector.broadcast %58 : f32 to vector<8x128xf32>
    %289 = arith.mulf %250, %288 : vector<8x128xf32>
    %290 = arith.addf %287, %289 : vector<8x128xf32>
    %291 = vector.broadcast %59 : f32 to vector<8x128xf32>
    %292 = arith.mulf %276, %291 : vector<8x128xf32>
    %293 = arith.addf %290, %292 : vector<8x128xf32>
    %294 = vector.broadcast %78 : f32 to vector<8x128xf32>
    %295 = arith.addf %293, %294 : vector<8x128xf32>
    %296 = math.tanh %295 : vector<8x128xf32>
    %297 = vector.broadcast %60 : f32 to vector<8x128xf32>
    %298 = arith.mulf %146, %297 : vector<8x128xf32>
    %299 = vector.broadcast %61 : f32 to vector<8x128xf32>
    %300 = arith.mulf %172, %299 : vector<8x128xf32>
    %301 = arith.addf %298, %300 : vector<8x128xf32>
    %302 = vector.broadcast %62 : f32 to vector<8x128xf32>
    %303 = arith.mulf %198, %302 : vector<8x128xf32>
    %304 = arith.addf %301, %303 : vector<8x128xf32>
    %305 = vector.broadcast %63 : f32 to vector<8x128xf32>
    %306 = arith.mulf %224, %305 : vector<8x128xf32>
    %307 = arith.addf %304, %306 : vector<8x128xf32>
    %308 = vector.broadcast %64 : f32 to vector<8x128xf32>
    %309 = arith.mulf %250, %308 : vector<8x128xf32>
    %310 = arith.addf %307, %309 : vector<8x128xf32>
    %311 = vector.broadcast %65 : f32 to vector<8x128xf32>
    %312 = arith.mulf %276, %311 : vector<8x128xf32>
    %313 = arith.addf %310, %312 : vector<8x128xf32>
    %314 = vector.broadcast %79 : f32 to vector<8x128xf32>
    %315 = arith.addf %313, %314 : vector<8x128xf32>
    %316 = math.tanh %315 : vector<8x128xf32>
    %317 = vector.broadcast %66 : f32 to vector<8x128xf32>
    %318 = arith.mulf %146, %317 : vector<8x128xf32>
    %319 = vector.broadcast %67 : f32 to vector<8x128xf32>
    %320 = arith.mulf %172, %319 : vector<8x128xf32>
    %321 = arith.addf %318, %320 : vector<8x128xf32>
    %322 = vector.broadcast %68 : f32 to vector<8x128xf32>
    %323 = arith.mulf %198, %322 : vector<8x128xf32>
    %324 = arith.addf %321, %323 : vector<8x128xf32>
    %325 = vector.broadcast %69 : f32 to vector<8x128xf32>
    %326 = arith.mulf %224, %325 : vector<8x128xf32>
    %327 = arith.addf %324, %326 : vector<8x128xf32>
    %328 = vector.broadcast %70 : f32 to vector<8x128xf32>
    %329 = arith.mulf %250, %328 : vector<8x128xf32>
    %330 = arith.addf %327, %329 : vector<8x128xf32>
    %331 = vector.broadcast %71 : f32 to vector<8x128xf32>
    %332 = arith.mulf %276, %331 : vector<8x128xf32>
    %333 = arith.addf %330, %332 : vector<8x128xf32>
    %334 = vector.broadcast %80 : f32 to vector<8x128xf32>
    %335 = arith.addf %333, %334 : vector<8x128xf32>
    %336 = math.tanh %335 : vector<8x128xf32>
    %337 = vector.broadcast %72 : f32 to vector<8x128xf32>
    %338 = arith.mulf %146, %337 : vector<8x128xf32>
    %339 = vector.broadcast %73 : f32 to vector<8x128xf32>
    %340 = arith.mulf %172, %339 : vector<8x128xf32>
    %341 = arith.addf %338, %340 : vector<8x128xf32>
    %342 = vector.broadcast %74 : f32 to vector<8x128xf32>
    %343 = arith.mulf %198, %342 : vector<8x128xf32>
    %344 = arith.addf %341, %343 : vector<8x128xf32>
    %345 = vector.broadcast %75 : f32 to vector<8x128xf32>
    %346 = arith.mulf %224, %345 : vector<8x128xf32>
    %347 = arith.addf %344, %346 : vector<8x128xf32>
    %348 = vector.broadcast %76 : f32 to vector<8x128xf32>
    %349 = arith.mulf %250, %348 : vector<8x128xf32>
    %350 = arith.addf %347, %349 : vector<8x128xf32>
    %351 = vector.broadcast %77 : f32 to vector<8x128xf32>
    %352 = arith.mulf %276, %351 : vector<8x128xf32>
    %353 = arith.addf %350, %352 : vector<8x128xf32>
    %354 = vector.broadcast %81 : f32 to vector<8x128xf32>
    %355 = arith.addf %353, %354 : vector<8x128xf32>
    %356 = math.tanh %355 : vector<8x128xf32>
    %357 = vector.broadcast %82 : f32 to vector<8x128xf32>
    %358 = arith.mulf %296, %357 : vector<8x128xf32>
    %359 = vector.broadcast %83 : f32 to vector<8x128xf32>
    %360 = arith.mulf %316, %359 : vector<8x128xf32>
    %361 = arith.addf %358, %360 : vector<8x128xf32>
    %362 = vector.broadcast %84 : f32 to vector<8x128xf32>
    %363 = arith.mulf %336, %362 : vector<8x128xf32>
    %364 = arith.addf %361, %363 : vector<8x128xf32>
    %365 = vector.broadcast %85 : f32 to vector<8x128xf32>
    %366 = arith.mulf %356, %365 : vector<8x128xf32>
    %367 = arith.addf %364, %366 : vector<8x128xf32>
    %368 = vector.broadcast %90 : f32 to vector<8x128xf32>
    %369 = arith.addf %367, %368 : vector<8x128xf32>
    %370 = math.tanh %369 : vector<8x128xf32>
    %371 = vector.broadcast %86 : f32 to vector<8x128xf32>
    %372 = arith.mulf %296, %371 : vector<8x128xf32>
    %373 = vector.broadcast %87 : f32 to vector<8x128xf32>
    %374 = arith.mulf %316, %373 : vector<8x128xf32>
    %375 = arith.addf %372, %374 : vector<8x128xf32>
    %376 = vector.broadcast %88 : f32 to vector<8x128xf32>
    %377 = arith.mulf %336, %376 : vector<8x128xf32>
    %378 = arith.addf %375, %377 : vector<8x128xf32>
    %379 = vector.broadcast %89 : f32 to vector<8x128xf32>
    %380 = arith.mulf %356, %379 : vector<8x128xf32>
    %381 = arith.addf %378, %380 : vector<8x128xf32>
    %382 = vector.broadcast %91 : f32 to vector<8x128xf32>
    %383 = arith.addf %381, %382 : vector<8x128xf32>
    %384 = math.tanh %383 : vector<8x128xf32>
    %385 = vector.broadcast %92 : f32 to vector<8x128xf32>
    %386 = arith.mulf %370, %385 : vector<8x128xf32>
    %387 = vector.broadcast %93 : f32 to vector<8x128xf32>
    %388 = arith.mulf %384, %387 : vector<8x128xf32>
    %389 = arith.addf %386, %388 : vector<8x128xf32>
    %390 = vector.broadcast %94 : f32 to vector<8x128xf32>
    %391 = arith.addf %389, %390 : vector<8x128xf32>
    %392 = math.tanh %391 : vector<8x128xf32>
    %cst = arith.constant 5.000000e-01 : f32
    %393 = vector.broadcast %cst : f32 to vector<8x128xf32>
    %394 = arith.mulf %393, %392 : vector<8x128xf32>
    %cst_16 = arith.constant 5.000000e-01 : f32
    %395 = vector.broadcast %cst_16 : f32 to vector<8x128xf32>
    %396 = arith.addf %394, %395 : vector<8x128xf32>
    %c0_17 = arith.constant 0 : index
    %397 = arith.index_cast %96 : i32 to index
    %c0_18 = arith.constant 0 : index
    %398 = vector.load %arg3[%c0_17, %397, %c0_18] : memref<1x8x128xf32, #tpu.memory_space<vmem>>, vector<1x8x128xf32>
    %399 = vector.shape_cast %398 : vector<1x8x128xf32> to vector<8x128xf32>
    %400 = vector.shape_cast %396 : vector<8x128xf32> to vector<1x8x128xf32>
    tpu.vector_store %arg3[%c0_17, %397, %c0_18], %400 {strides = array<i32>} : memref<1x8x128xf32, #tpu.memory_space<vmem>>, vector<1x8x128xf32>,
    %c1_i32 = arith.constant 1 : i32
    return
  }
  func.func @transform_0(%arg0: i32) -> i32 {
    %c0_i32 = arith.constant 0 : i32
    %c0_i32_0 = arith.constant 0 : i32
    return %c0_i32 : i32
  }
  func.func @transform_1(%arg0: i32) -> (i32, i32, i32) {
    %c0_i32 = arith.constant 0 : i32
    %c0_i32_0 = arith.constant 0 : i32
    %c0_i32_1 = arith.constant 0 : i32
    return %c0_i32, %arg0, %c0_i32_0 : i32, i32, i32
  }
  func.func @transform_2(%arg0: i32) -> (i32, i32, i32) {
    %c0_i32 = arith.constant 0 : i32
    %c0_i32_0 = arith.constant 0 : i32
    %c0_i32_1 = arith.constant 0 : i32
    return %c0_i32, %arg0, %c0_i32_0 : i32, i32, i32
  }
}

</mosaic_0001>

<bundles_post_ra>
// kernel: tpu_custom_call.1
= control target key start
LH: loop header
LB: loop body
LE: loop exit
PB: predicated region body
PF: predicated region fallthrough
CT: control target
= control target key end

     0   :  { %7 = vsyncpa [#allocation5], 0  ;;  %s1006_s0 = inlined_call_operand.hbm [shape: f32[95], index: 0, kind: input, shape index: {}]   ;;  %s1007_s1 = inlined_call_operand.hbm [shape: f32[8,8,128], index: 1, kind: input, shape index: {}]   ;;  %s1008_s2 = inlined_call_operand.hbm [shape: f32[1,8,128], index: 2, kind: output, shape index: {}]  }
   0x1   :  { %8 = vsyncpa [#allocation3], 0 }
   0x2   :  { %9 = vsyncpa [#allocation4], 0  ;;  %s577_s11 = scalar_lea.hbm %s1006_s0, 16 }
   0x3   :  { %p578_p0 = scmp.ne.s32.totalorder %s1006_s0, %s577_s11  ;;  %p581_p1 = scmp.lt.u32.totalorder %s577_s11, %s1006_s0 }
   0x5   :  { %p583_p2 = pnand %p581_p1, %p578_p0 }
   0x7   :  { %586 = shalt.err (!%p583_p2)
}
   0x8   :  { %s637_s16 = smov [#allocation2]   ;;  %s638_s19 = smov [#allocation6]  }
   0x9   :  { %17 = dma.hbm_to_smem %s1006_s0, 16, %s637_s16, [#allocation5]  }
   0xa   :  { %s23_s20 = sshll.u32 %s638_s19, 4  ;;  %s587_s23 = scalar_lea.hbm %s1007_s1, 1024  ;;  %s24_s20 = int_to_ptr.vmem [resolvable:$true] %s23_s20 }
   0xb   :  { %p588_p3 = scmp.ne.s32.totalorder %s1007_s1, %s587_s23  ;;  %p591_p4 = scmp.lt.u32.totalorder %s587_s23, %s1007_s1 }
   0xd   :  { %p593_p5 = pnand %p591_p4, %p588_p3 }
   0xf   :  { %596 = shalt.err (!%p593_p5)
}
  0x10   :  { %s597_s28 = scalar_lea.vmem %s24_s20, 1024  ;;  %p602_p7 = scmp.lt.s32.totalorder %s24_s20, %s24_s20 }
  0x11   :  { %p598_p6 = scmp.ne.s32.totalorder %s24_s20, %s597_s28  ;;  %p603_p8 = scmp.lt.s32.totalorder %s597_s28, %s597_s28 }
  0x13   :  { %p604_p9 = por %p603_p8, %p602_p7 }
  0x15   :  { %p605_p10 = pnand %p604_p9, %p598_p6 }
  0x17   :  { %608 = shalt.err (!%p605_p10)
}
  0x18   :  { %s639_s0 = smov 128   ;;  %s640_s29 = smov 8  }
  0x19   :  { %29 = dma.hbm_to_vmem [thread:$0]  %s1007_s1, 1024, %s24_s20, [#allocation3], %s639_s0, %s639_s0, %s640_s29  }
  0x1a   :  { %631 = dma.done.wait [#allocation5], 16  }
  0x1b   :  { %632 = vsyncadd [#allocation5], 4294967280 }
  0x1c   :  { %633 = dma.done.wait [#allocation3], 1024  }
  0x1d   :  { %634 = vsyncadd [#allocation3], 4294966272 }
  0x1e   :  { %36 = sfence }
  0x1f   :  { %s37_s4 = sld [smem:[#allocation2]]  ;;  %s452_s5 = sld [smem:[#allocation2 + $0x1]]  ;;  %v695_v0 = vld [vmem:[#allocation6] sm:$0xff]  ;;  %v697_v1 = vld [vmem:[#allocation6 + $0x8] sm:$0xff]  ;;  %v703_v2 = vld [vmem:[#allocation6 + $0x10] sm:$0xff] }
  0x20   :  { %s453_s6 = sld [smem:[#allocation2 + $0x2]]  ;;  %s681_s7 = sld [smem:[#allocation2 + $0x3]]  ;;  %v709_v3 = vld [vmem:[#allocation6 + $0x18] sm:$0xff]  ;;  %v711_v4 = vld [vmem:[#allocation6 + $0x20] sm:$0xff]  ;;  %v717_v7 = vld [vmem:[#allocation6 + $0x28] sm:$0xff] }
  0x21   :  { %s683_s8 = sld [smem:[#allocation2 + $0x4]]  ;;  %s685_s9 = sld [smem:[#allocation2 + $0x5]]  ;;  %v743_v22 = vld [vmem:[#allocation6 + $0x30] sm:$0xff]  ;;  %v745_v23 = vld [vmem:[#allocation6 + $0x38] sm:$0xff] }
  0x22   :  { %s687_s10 = sld [smem:[#allocation2 + $0x6]]  ;;  %s689_s11 = sld [smem:[#allocation2 + $0x7]] }
  0x23   :  { %s691_s12 = sld [smem:[#allocation2 + $0x8]]  ;;  %s693_s1 = sld [smem:[#allocation2 + $0x9]] }
  0x24   :  { %s699_s13 = sld [smem:[#allocation2 + $0xa]]  ;;  %s701_s14 = sld [smem:[#allocation2 + $0xb]] }
  0x25   :  { %s705_s15 = sld [smem:[#allocation2 + $0xc]]  ;;  %s707_s16 = sld [smem:[#allocation2 + $0xd]]  ;;  %v154_v5 = vstv %s37_s4  ;;  %v156_v6 = vstv %s452_s5 }
  0x26   :  { %s713_s17 = sld [smem:[#allocation2 + $0xe]]  ;;  %s715_s18 = sld [smem:[#allocation2 + $0xf]]  ;;  %v155_v8 = vmul.f32 %v154_v5, %v695_v0  ;;  %v157_v9 = vmul.f32 %v156_v6, %v697_v1  ;;  %v159_v10 = vstv %s453_s6  ;;  %v162_v11 = vstv %s681_s7 }
  0x27   :  { %s722_s19 = sld [smem:[#allocation2 + $0x10]]  ;;  %s724_s20 = sld [smem:[#allocation2 + $0x11]]  ;;  %v160_v12 = vmul.f32 %v159_v10, %v703_v2  ;;  %v165_v13 = vstv %s683_s8  ;;  %v168_v14 = vstv %s685_s9  ;;  %v163_v16 = vmul.f32 %v162_v11, %v709_v3 }
  0x28   :  { %s729_s21 = sld [smem:[#allocation2 + $0x12]]  ;;  %s731_s22 = sld [smem:[#allocation2 + $0x13]]  ;;  %v158_v15 = vadd.f32 %v157_v9, %v155_v8  ;;  %v166_v17 = vmul.f32 %v165_v13, %v711_v4  ;;  %v169_v18 = vmul.f32 %v168_v14, %v717_v7  ;;  %v171_v19 = vstv %s687_s10 }
  0x29   :  { %s735_s23 = sld [smem:[#allocation2 + $0x14]]  ;;  %s737_s24 = sld [smem:[#allocation2 + $0x15]]  ;;  %v180_v20 = vstv %s691_s12  ;;  %v182_v21 = vstv %s693_s1  ;;  %v174_v25 = vstv %s689_s11  ;;  %v172_v36 = vmul.f32 %v171_v19, %v743_v22 }
  0x2a   :  { %v161_v24 = vadd.f32 %v160_v12, %v158_v15  ;;  %v181_v26 = vmul.f32 %v180_v20, %v695_v0  ;;  %v183_v27 = vmul.f32 %v182_v21, %v697_v1  ;;  %s750_s25 = sld [smem:[#allocation2 + $0x18]]  ;;  %v185_v28 = vstv %s699_s13  ;;  %s756_s26 = sld [smem:[#allocation2 + $0x16]] }
  0x2b   :  { %v188_v29 = vstv %s701_s14  ;;  %v191_v30 = vstv %s705_s15  ;;  %v194_v31 = vstv %s707_s16  ;;  %s758_s27 = sld [smem:[#allocation2 + $0x17]]  ;;  %v186_v34 = vmul.f32 %v185_v28, %v703_v2  ;;  %s762_s28 = sld [smem:[#allocation2 + $0x19]] }
  0x2c   :  { %v164_v32 = vadd.f32 %v163_v16, %v161_v24  ;;  %v184_v33 = vadd.f32 %v183_v27, %v181_v26  ;;  %v189_v35 = vmul.f32 %v188_v29, %v709_v3  ;;  %s764_s0 = sld [smem:[#allocation2 + $0x1a]]  ;;  %v175_v37 = vmul.f32 %v174_v25, %v745_v23  ;;  %s770_s29 = sld [smem:[#allocation2 + $0x1b]] }
  0x2d   :  { %v192_v38 = vmul.f32 %v191_v30, %v711_v4  ;;  %v195_v39 = vmul.f32 %v194_v31, %v717_v7  ;;  %s772_s30 = sld [smem:[#allocation2 + $0x1c]]  ;;  %v197_v42 = vstv %s713_s17  ;;  %v200_v43 = vstv %s715_s18  ;;  %s776_s3 = sld [smem:[#allocation2 + $0x1d]] }
  0x2e   :  { %v167_v40 = vadd.f32 %v166_v17, %v164_v32  ;;  %v187_v41 = vadd.f32 %v186_v34, %v184_v33  ;;  %s778_s4 = sld [smem:[#allocation2 + $0x1e]]  ;;  %v206_v44 = vstv %s722_s19  ;;  %v208_v45 = vstv %s724_s20  ;;  %s790_s5 = sld [smem:[#allocation2 + $0x1f]] }
  0x2f   :  { %v211_v46 = vstv %s729_s21  ;;  %v214_v47 = vstv %s731_s22  ;;  %v207_v50 = vmul.f32 %v206_v44, %v695_v0  ;;  %v209_v51 = vmul.f32 %v208_v45, %v697_v1  ;;  %s792_s6 = sld [smem:[#allocation2 + $0x20]]  ;;  %s795_s7 = sld [smem:[#allocation2 + $0x21]] }
  0x30   :  { %v170_v48 = vadd.f32 %v169_v18, %v167_v40  ;;  %v190_v49 = vadd.f32 %v189_v35, %v187_v41  ;;  %v198_v52 = vmul.f32 %v197_v42, %v743_v22  ;;  %v212_v53 = vmul.f32 %v211_v46, %v703_v2  ;;  %s797_s8 = sld [smem:[#allocation2 + $0x22]]  ;;  %s803_s9 = sld [smem:[#allocation2 + $0x23]] }
  0x31   :  { %v217_v54 = vstv %s735_s23  ;;  %v220_v55 = vstv %s737_s24  ;;  %v210_v58 = vadd.f32 %v209_v51, %v207_v50  ;;  %v215_v59 = vmul.f32 %v214_v47, %v709_v3  ;;  %s807_s10 = sld [smem:[#allocation2 + $0x24]]  ;;  %s812_s11 = sld [smem:[#allocation2 + $0x25]] }
  0x32   :  { %v173_v56 = vadd.f32 %v172_v36, %v170_v48  ;;  %v193_v57 = vadd.f32 %v192_v38, %v190_v49  ;;  %v201_v60 = vmul.f32 %v200_v43, %v745_v23  ;;  %v218_v61 = vmul.f32 %v217_v54, %v711_v4  ;;  %s816_s12 = sld [smem:[#allocation2 + $0x30]]  ;;  %s818_s1 = sld [smem:[#allocation2 + $0x31]] }
  0x33   :  { %v221_v62 = vmul.f32 %v220_v55, %v717_v7  ;;  %v232_v63 = vstv %s750_s25  ;;  %v213_v6 = vadd.f32 %v212_v53, %v210_v58  ;;  %v223_v8 = vstv %s756_s26  ;;  %s824_s13 = sld [smem:[#allocation2 + $0x26]]  ;;  %s826_s14 = sld [smem:[#allocation2 + $0x32]] }
  0x34   :  { %v196_v5 = vadd.f32 %v195_v39, %v193_v57  ;;  %v226_v9 = vstv %s758_s27  ;;  %v176_v10 = vadd.f32 %v175_v37, %v173_v56  ;;  %v233_v11 = vmul.f32 %v232_v63, %v695_v0  ;;  %s833_s15 = sld [smem:[#allocation2 + $0x27]]  ;;  %s835_s16 = sld [smem:[#allocation2 + $0x33]] }
  0x35   :  { %v234_v12 = vstv %s762_s28  ;;  %v237_v13 = vstv %s764_s0  ;;  %v216_v15 = vadd.f32 %v215_v59, %v213_v6  ;;  %v240_v18 = vstv %s770_s29  ;;  %s839_s17 = sld [smem:[#allocation2 + $0x28]]  ;;  %s841_s18 = sld [smem:[#allocation2 + $0x29]] }
  0x36   :  { %v199_v14 = vadd.f32 %v198_v52, %v196_v5  ;;  %v235_v16 = vmul.f32 %v234_v12, %v697_v1  ;;  %v238_v17 = vmul.f32 %v237_v13, %v703_v2  ;;  %v243_v19 = vstv %s772_s30  ;;  %s847_s19 = sld [smem:[#allocation2 + $0x2a]]  ;;  %s849_s20 = sld [smem:[#allocation2 + $0x2b]] }
  0x37   :  { %v246_v20 = vstv %s776_s3  ;;  %v249_v21 = vstv %s778_s4  ;;  %v219_v24 = vadd.f32 %v218_v61, %v216_v15  ;;  %v224_v25 = vmul.f32 %v223_v8, %v743_v22  ;;  %s857_s21 = sld [smem:[#allocation2 + $0x2c]]  ;;  %s862_s22 = sld [smem:[#allocation2 + $0x2d]] }
  0x38   :  { %v236_v26 = vadd.f32 %v235_v16, %v233_v11  ;;  %v241_v27 = vmul.f32 %v240_v18, %v709_v3  ;;  %v202_v28 = vadd.f32 %v201_v60, %v199_v14  ;;  %v227_v29 = vmul.f32 %v226_v9, %v745_v23  ;;  %s864_s23 = sld [smem:[#allocation2 + $0x2e]]  ;;  %s868_s24 = sld [smem:[#allocation2 + $0x34]] }
  0x39   :  { %v244_v30 = vmul.f32 %v243_v19, %v711_v4  ;;  %v247_v31 = vmul.f32 %v246_v20, %v717_v7  ;;  %v222_v32 = vadd.f32 %v221_v62, %v219_v24  ;;  %v250_v34 = vmul.f32 %v249_v21, %v743_v22  ;;  %s871_s25 = sld [smem:[#allocation2 + $0x36]]  ;;  %s873_s26 = sld [smem:[#allocation2 + $0x37]] }
  0x3a   :  { %v239_v33 = vadd.f32 %v238_v17, %v236_v26  ;;  %v258_v35 = vstv %s792_s6  ;;  %v252_v36 = vstv %s790_s5  ;;  %v260_v38 = vstv %s795_s7  ;;  %s880_s27 = sld [smem:[#allocation2 + $0x2f]]  ;;  %s882_s28 = sld [smem:[#allocation2 + $0x3c]] }
  0x3b   :  { %v259_v37 = vmul.f32 %v258_v35, %v695_v0  ;;  %v263_v39 = vstv %s797_s8  ;;  %v225_v40 = vadd.f32 %v224_v25, %v222_v32  ;;  %v261_v42 = vmul.f32 %v260_v38, %v697_v1  ;;  %s888_s0 = sld [smem:[#allocation2 + $0x38]]  ;;  %s892_s29 = sld [smem:[#allocation2 + $0x3d]] }
  0x3c   :  { %v242_v41 = vadd.f32 %v241_v27, %v239_v33  ;;  %v266_v43 = vstv %s803_s9  ;;  %v177_v44 = vstv %s816_s12  ;;  %v203_v45 = vstv %s818_s1  ;;  %s894_s30 = sld [smem:[#allocation2 + $0x3e]]  ;;  %s899_s3 = sld [smem:[#allocation2 + $0x35]] }
  0x3d   :  { %v264_v46 = vmul.f32 %v263_v39, %v703_v2  ;;  %v269_v47 = vstv %s807_s10  ;;  %v178_v48 = vadd.f32 %v177_v44, %v176_v10  ;;  %v204_v49 = vadd.f32 %v203_v45, %v202_v28  ;;  %s903_s4 = sld [smem:[#allocation2 + $0x42]]  ;;  %s905_s5 = sld [smem:[#allocation2 + $0x43]] }
  0x3e   :  { %v228_v50 = vadd.f32 %v227_v29, %v225_v40  ;;  %v229_v51 = vstv %s826_s14  ;;  %v245_v52 = vadd.f32 %v244_v30, %v242_v41  ;;  %v253_v53 = vmul.f32 %v252_v36, %v745_v23  ;;  %s910_s6 = sld [smem:[#allocation2 + $0x39]]  ;;  %s912_s7 = sld [smem:[#allocation2 + $0x44]] }
  0x3f   :  { %v262_v54 = vadd.f32 %v261_v42, %v259_v37  ;;  %v267_v55 = vmul.f32 %v266_v43, %v709_v3  ;;  %551 = vtanh.f32 %v178_v48  ;;  %v272_v57 = vstv %s812_s11  ;;  %s919_s8 = sld [smem:[#allocation2 + $0x3f]]  ;;  %s921_s9 = sld [smem:[#allocation2 + $0x45]] }
  0x40   :  { %v230_v56 = vadd.f32 %v229_v51, %v228_v50  ;;  %v275_v58 = vstv %s824_s13  ;;  %553 = vtanh.f32 %v204_v49  ;;  %v248_v59 = vadd.f32 %v247_v31, %v245_v52  ;;  %s929_s10 = sld [smem:[#allocation2 + $0x48]]  ;;  %s933_s11 = sld [smem:[#allocation2 + $0x49]] }
  0x41   :  { %v265_v60 = vadd.f32 %v264_v46, %v262_v54  ;;  %v270_v61 = vmul.f32 %v269_v47, %v711_v4  ;;  %v255_v62 = vstv %s835_s16  ;;  %v273_v63 = vmul.f32 %v272_v57, %v717_v7  ;;  %s937_s12 = sld [smem:[#allocation2 + $0x4a]]  ;;  %s939_s1 = sld [smem:[#allocation2 + $0x4b]] }
  0x42   :  { %555 = vtanh.f32 %v230_v56  ;;  %v276_v5 = vmul.f32 %v275_v58, %v743_v22  ;;  %v251_v6 = vadd.f32 %v250_v34, %v248_v59  ;;  %v278_v9 = vstv %s833_s15  ;;  %s943_s13 = sld [smem:[#allocation2 + $0x3a]]  ;;  %s945_s14 = sld [smem:[#allocation2 + $0x40]] }
  0x43   :  { %v268_v8 = vadd.f32 %v267_v55, %v265_v60  ;;  %v284_v10 = vstv %s839_s17  ;;  %v286_v12 = vstv %s841_s18  ;;  %v289_v13 = vstv %s847_s19  ;;  %s948_s15 = sld [smem:[#allocation2 + $0x46]]  ;;  %s950_s16 = sld [smem:[#allocation2 + $0x4c]] }
  0x44   :  { %v285_v11 = vmul.f32 %v284_v10, %v695_v0  ;;  %v292_v14 = vstv %s849_s20  ;;  %v254_v15 = vadd.f32 %v253_v53, %v251_v6  ;;  %v287_v17 = vmul.f32 %v286_v12, %v697_v1  ;;  %s961_s17 = sld [smem:[#allocation2 + $0x3b]]  ;;  %s963_s18 = sld [smem:[#allocation2 + $0x41]] }
  0x45   :  { %v271_v16 = vadd.f32 %v270_v61, %v268_v8  ;;  %v290_v18 = vmul.f32 %v289_v13, %v703_v2  ;;  %v279_v19 = vmul.f32 %v278_v9, %v745_v23  ;;  %v295_v0 = vstv %s857_s21  ;;  %s966_s19 = sld [smem:[#allocation2 + $0x47]]  ;;  %s968_s20 = sld [smem:[#allocation2 + $0x4d]] }
  0x46   :  { %v256_v20 = vadd.f32 %v255_v62, %v254_v15  ;;  %v288_v24 = vadd.f32 %v287_v17, %v285_v11  ;;  %v293_v25 = vmul.f32 %v292_v14, %v709_v3  ;;  %v298_v1 = vstv %s862_s22  ;;  %s978_s21 = sld [smem:[#allocation2 + $0x4e]]  ;;  %s980_s22 = sld [smem:[#allocation2 + $0x4f]] }
  0x47   :  { %v274_v21 = vadd.f32 %v273_v63, %v271_v16  ;;  %v301_v26 = vstv %s864_s23  ;;  %v296_v28 = vmul.f32 %v295_v0, %v711_v4  ;;  %v281_v3 = vstv %s868_s24  ;;  %s982_s23 = sld [smem:[#allocation2 + $0x50]]  ;;  %s984_s24 = sld [smem:[#allocation2 + $0x51]] }
  0x48   :  { %557 = vtanh.f32 %v256_v20  ;;  %v291_v27 = vadd.f32 %v290_v18, %v288_v24  ;;  %v310_v30 = vstv %s871_s25  ;;  %v312_v31 = vstv %s873_s26  ;;  %s533_s25 = sld [smem:[#allocation2 + $0x52]]  ;;  %s537_s26 = sld [smem:[#allocation2 + $0x56]] }
  0x49   :  { %v277_v2 = vadd.f32 %v276_v5, %v274_v21  ;;  %v908_v29 = vpop.eup %551  ;;  %v299_v34 = vmul.f32 %v298_v1, %v717_v7  ;;  %v302_v35 = vmul.f32 %v301_v26, %v743_v22  ;;  %v304_v37 = vstv %s880_s27  ;;  %s534_s27 = sld [smem:[#allocation2 + $0x53]] }
  0x4a   :  { %v917_v32 = vpop.eup %553  ;;  %v294_v4 = vadd.f32 %v293_v25, %v291_v27  ;;  %v311_v38 = vmul.f32 %v908_v29, %v310_v30  ;;  %v330_v40 = vstv %s882_s28  ;;  %v315_v43 = vstv %s888_s0  ;;  %s538_s28 = sld [smem:[#allocation2 + $0x57]]  ;;  %s535_s0 = sld [smem:[#allocation2 + $0x54]] }
  0x4b   :  { %v280_v33 = vadd.f32 %v279_v19, %v277_v2  ;;  %v313_v39 = vmul.f32 %v917_v32, %v312_v31  ;;  %v331_v44 = vmul.f32 %v908_v29, %v330_v40  ;;  %v332_v7 = vstv %s892_s29  ;;  %s539_s29 = sld [smem:[#allocation2 + $0x58]] }
  0x4c   :  { %v556_v36 = vpop.eup %555  ;;  %v297_v42 = vadd.f32 %v296_v28, %v294_v4  ;;  %v335_v45 = vstv %s894_s30  ;;  %v305_v46 = vmul.f32 %v304_v37, %v745_v23  ;;  %v333_v47 = vmul.f32 %v917_v32, %v332_v7  ;;  %s536_s30 = sld [smem:[#allocation2 + $0x55]] }
  0x4d   :  { %v282_v41 = vadd.f32 %v281_v3, %v280_v33  ;;  %v307_v48 = vstv %s899_s3  ;;  %v314_v49 = vadd.f32 %v313_v39, %v311_v38  ;;  %v316_v50 = vmul.f32 %v556_v36, %v315_v43  ;;  %s540_s3 = sld [smem:[#allocation2 + $0x59]] }
  0x4e   :  { %v300_v22 = vadd.f32 %v299_v34, %v297_v42  ;;  %v336_v51 = vmul.f32 %v556_v36, %v335_v45  ;;  %v334_v53 = vadd.f32 %v333_v47, %v331_v44  ;;  %v350_v23 = vstv %s903_s4  ;;  %s541_s4 = sld [smem:[#allocation2 + $0x5a]] }
  0x4f   :  { %559 = vtanh.f32 %v282_v41  ;;  %v352_v54 = vstv %s905_s5  ;;  %v318_v55 = vstv %s910_s6  ;;  %v351_v56 = vmul.f32 %v908_v29, %v350_v23  ;;  %s542_s5 = sld [smem:[#allocation2 + $0x5b]]  ;;  %s543_s6 = sld [smem:[#allocation2 + $0x5c]] }
  0x50   :  { %v303_v52 = vadd.f32 %v302_v35, %v300_v22  ;;  %v353_v57 = vmul.f32 %v917_v32, %v352_v54  ;;  %v355_v58 = vstv %s912_s7  ;;  %v338_v61 = vstv %s919_s8  ;;  %s544_s7 = sld [smem:[#allocation2 + $0x5d]]  ;;  %s545_s8 = sld [smem:[#allocation2 + $0x5e]] }
  0x51   :  { %v356_v62 = vmul.f32 %v556_v36, %v355_v58  ;;  %v358_v63 = vstv %s921_s9  ;;  %v317_v5 = vadd.f32 %v316_v50, %v314_v49  ;;  %v337_v10 = vadd.f32 %v336_v51, %v334_v53  ;;  %s641_s9 = smov [#allocation7]  }
  0x52   :  { %v558_v59 = vpop.eup %557  ;;  %v306_v60 = vadd.f32 %v305_v46, %v303_v52  ;;  %v354_v6 = vadd.f32 %v353_v57, %v351_v56  ;;  %v370_v11 = vstv %s929_s10  ;;  %v372_v16 = vstv %s933_s11  ;;  %s435_s10 = sshll.u32 %s641_s9, 4  ;;  %s436_s10 = int_to_ptr.vmem [resolvable:$true] %s435_s10 }
  0x53   :  { %v319_v9 = vmul.f32 %v558_v59, %v318_v55  ;;  %v339_v12 = vmul.f32 %v558_v59, %v338_v61  ;;  %v359_v14 = vmul.f32 %v558_v59, %v358_v63  ;;  %v371_v15 = vmul.f32 %v908_v29, %v370_v11  ;;  %s609_s11 = scalar_lea.vmem %s436_s10, 128  ;;  %p614_p12 = scmp.lt.s32.totalorder %s436_s10, %s436_s10 }
  0x54   :  { %v308_v8 = vadd.f32 %v307_v48, %v306_v60  ;;  %v357_v13 = vadd.f32 %v356_v62, %v354_v6  ;;  %v375_v17 = vstv %s937_s12  ;;  %v378_v18 = vstv %s939_s1  ;;  %p610_p11 = scmp.ne.s32.totalorder %s436_s10, %s609_s11  ;;  %p615_p13 = scmp.lt.s32.totalorder %s609_s11, %s609_s11 }
  0x55   :  { %v321_v19 = vstv %s943_s13  ;;  %v373_v0 = vmul.f32 %v917_v32, %v372_v16  ;;  %v376_v20 = vmul.f32 %v556_v36, %v375_v17  ;;  %v341_v24 = vstv %s945_s14 }
  0x56   :  { %561 = vtanh.f32 %v308_v8  ;;  %v361_v25 = vstv %s948_s15  ;;  %v381_v1 = vstv %s950_s16  ;;  %v379_v2 = vmul.f32 %v558_v59, %v378_v18  ;;  %p616_p0 = por %p615_p13, %p614_p12 }
  0x57   :  { %v374_v26 = vadd.f32 %v373_v0, %v371_v15  ;;  %v320_v27 = vadd.f32 %v319_v9, %v317_v5  ;;  %v340_v29 = vadd.f32 %v339_v12, %v337_v10  ;;  %v360_v3 = vadd.f32 %v359_v14, %v357_v13 }
  0x58   :  { %v324_v34 = vstv %s961_s17  ;;  %v344_v35 = vstv %s963_s18  ;;  %v364_v36 = vstv %s966_s19  ;;  %v384_v37 = vstv %s968_s20  ;;  %p617_p1 = pnand %p616_p0, %p610_p11 }
  0x59   :  { %v560_v21 = vpop.eup %559  ;;  %v377_v32 = vadd.f32 %v376_v20, %v374_v26  ;;  %v327_v22 = vstv %s978_s21  ;;  %v347_v46 = vstv %s980_s22  ;;  %v367_v47 = vstv %s982_s23 }
  0x5a   :  { %v322_v28 = vmul.f32 %v560_v21, %v321_v19  ;;  %v342_v30 = vmul.f32 %v560_v21, %v341_v24  ;;  %v362_v31 = vmul.f32 %v560_v21, %v361_v25  ;;  %v382_v33 = vmul.f32 %v560_v21, %v381_v1 }
  0x5b   :  { %v380_v4 = vadd.f32 %v379_v2, %v377_v32  ;;  %v387_v48 = vstv %s984_s24  ;;  %v390_v56 = vstv %s533_s25  ;;  %v404_v57 = vstv %s537_s26 }
  0x5c   :  { %v323_v38 = vadd.f32 %v322_v28, %v320_v27  ;;  %v343_v39 = vadd.f32 %v342_v30, %v340_v29  ;;  %v363_v40 = vadd.f32 %v362_v31, %v360_v3  ;;  %v392_v58 = vstv %s534_s27 }
  0x5d   :  { %v383_v41 = vadd.f32 %v382_v33, %v380_v4  ;;  %v406_v59 = vstv %s538_s28  ;;  %v395_v61 = vstv %s535_s0  ;;  %v409_v62 = vstv %s539_s29 }
  0x5e   :  { %v398_v6 = vstv %s536_s30  ;;  %v412_v9 = vstv %s540_s3  ;;  %v401_v21 = vstv %s541_s4  ;;  %v415_v24 = vstv %s542_s5 }
  0x5f   :  { %v418_v27 = vstv %s543_s6  ;;  %v420_v28 = vstv %s544_s7  ;;  %v423_v32 = vstv %s545_s8 }
  0x60   :  { %v562_v42 = vpop.eup %561 }
  0x61   :  { %v325_v43 = vmul.f32 %v562_v42, %v324_v34  ;;  %v345_v44 = vmul.f32 %v562_v42, %v344_v35  ;;  %v365_v7 = vmul.f32 %v562_v42, %v364_v36  ;;  %v385_v45 = vmul.f32 %v562_v42, %v384_v37 }
  0x63   :  { %v326_v49 = vadd.f32 %v325_v43, %v323_v38  ;;  %v346_v50 = vadd.f32 %v345_v44, %v343_v39  ;;  %v366_v51 = vadd.f32 %v365_v7, %v363_v40  ;;  %v386_v52 = vadd.f32 %v385_v45, %v383_v41 }
  0x65   :  { %v328_v53 = vadd.f32 %v327_v22, %v326_v49  ;;  %v348_v23 = vadd.f32 %v347_v46, %v346_v50  ;;  %v368_v54 = vadd.f32 %v367_v47, %v366_v51  ;;  %v388_v55 = vadd.f32 %v387_v48, %v386_v52 }
  0x67   :  { %563 = vtanh.f32 %v328_v53 }
  0x68   :  { %565 = vtanh.f32 %v348_v23 }
  0x69   :  { %567 = vtanh.f32 %v368_v54 }
  0x6a   :  { %569 = vtanh.f32 %v388_v55 }
  0x71   :  { %v564_v60 = vpop.eup %563 }
  0x72   :  { %v566_v63 = vpop.eup %565  ;;  %v391_v5 = vmul.f32 %v564_v60, %v390_v56  ;;  %v405_v8 = vmul.f32 %v564_v60, %v404_v57 }
  0x73   :  { %v568_v10 = vpop.eup %567  ;;  %v393_v11 = vmul.f32 %v566_v63, %v392_v58  ;;  %v407_v12 = vmul.f32 %v566_v63, %v406_v59 }
  0x74   :  { %v570_v13 = vpop.eup %569  ;;  %v396_v14 = vmul.f32 %v568_v10, %v395_v61  ;;  %v410_v15 = vmul.f32 %v568_v10, %v409_v62 }
  0x75   :  { %v394_v16 = vadd.f32 %v393_v11, %v391_v5  ;;  %v399_v17 = vmul.f32 %v570_v13, %v398_v6  ;;  %v408_v18 = vadd.f32 %v407_v12, %v405_v8  ;;  %v413_v19 = vmul.f32 %v570_v13, %v412_v9 }
  0x77   :  { %v397_v0 = vadd.f32 %v396_v14, %v394_v16  ;;  %v411_v20 = vadd.f32 %v410_v15, %v408_v18 }
  0x79   :  { %v400_v25 = vadd.f32 %v399_v17, %v397_v0  ;;  %v414_v1 = vadd.f32 %v413_v19, %v411_v20 }
  0x7b   :  { %v402_v26 = vadd.f32 %v401_v21, %v400_v25  ;;  %v416_v2 = vadd.f32 %v415_v24, %v414_v1 }
  0x7d   :  { %571 = vtanh.f32 %v402_v26 }
  0x7e   :  { %573 = vtanh.f32 %v416_v2 }
  0x87   :  { %v572_v29 = vpop.eup %571 }
  0x88   :  { %v574_v3 = vpop.eup %573  ;;  %v419_v30 = vmul.f32 %v572_v29, %v418_v27 }
  0x89   :  { %v421_v31 = vmul.f32 %v574_v3, %v420_v28 }
  0x8b   :  { %v422_v33 = vadd.f32 %v421_v31, %v419_v30 }
  0x8d   :  { %v424_v4 = vadd.f32 %v423_v32, %v422_v33 }
  0x8f   :  { %575 = vtanh.f32 %v424_v4 }
  0x99   :  { %v576_v34 = vpop.eup %575 }
  0x9a   :  { %v426_v35 = vmul.f32 0.5, %v576_v34 }
  0x9c   :  { %v427_v36 = vadd.f32 0.5, %v426_v35 }
  0x9e   :  { %428 = vst [vmem:[#allocation7] sm:$0xff] %v427_v36 }
  0x9f   :  { %620 = shalt.err (!%p617_p1)
}
  0xa0   :  { %s621_s13 = scalar_lea.hbm %s1008_s2, 128 }
  0xa1   :  { %p622_p2 = scmp.ne.s32.totalorder %s1008_s2, %s621_s13  ;;  %p625_p3 = scmp.lt.u32.totalorder %s621_s13, %s1008_s2 }
  0xa3   :  { %p627_p4 = pnand %p625_p3, %p622_p2 }
  0xa5   :  { %630 = shalt.err (!%p627_p4)
}
  0xa6   :  { %438 = dma.vmem_to_hbm [thread:$0]  %s436_s10, 128, %s1008_s2, [#allocation4]  }
  0xa7   :  { %635 = dma.done.wait [#allocation4], 128  }
  0xa8   :  { %636 = vsyncadd [#allocation4], 4294967168 }
  0xa9   :  { %442 = vsyncpa [#allocation3], 1 }
  0xaa   :  { %443 = vsyncpa [#allocation4], 1 }
  0xab   :  { %444 = vsyncpa [#allocation5], 1 }

</bundles_post_ra>
